<compile_context>
chip_gen: v7x
topology: tpu7x:2x2x1
jax: 0.10.0
libtpu: 0.0.40
codegen_flags: <defaults>
</compile_context>

<pallas_src>
import functools

import jax
import jax.numpy as jnp
from jax import lax
from jax.experimental import pallas as pl
from jax.experimental.pallas import tpu as pltpu


def _encoder_kernel(x_ref, wqkv_ref, bqkv_ref, wo_ref, bo_ref, out_ref, *scratch,
                    num_layers, key_chunk, compute_dtype, chunked):
    """One (Nb, L, E) batch block per grid step; the whole layer stack runs in-kernel.

    x_ref     : (Nb, L, E)  activation block
    wqkv_ref  : (E, 3E)     fused, pre-transposed QKV weight (1/sqrt(dh) folded into q)
    bqkv_ref  : (1, 3E)     fused f32 bias (q slice pre-scaled)
    wo_ref    : (E, E)      pre-transposed output projection
    bo_ref    : (1, E)      f32 bias
    out_ref   : (Nb, L, E)
    scratch   : ()                    direct-softmax fast path, or
                (k_sc, v_sc) (Nb,L,E) VMEM scratch for the chunked fallback
    """
    Nb, L, E = x_ref.shape
    M = Nb * L
    cdt = compute_dtype
    use_approx = jnp.dtype(cdt) == jnp.dtype(jnp.bfloat16)
    eps = 1e-5

    def layer(_, x):                      # x: (Nb, L, E) f32
        # Fused QKV projection: one (M, E) @ (E, 3E) matmul, f32 accumulate.
        xf = x.reshape(M, E).astype(cdt)
        qkv = (jnp.dot(xf, wqkv_ref[...], preferred_element_type=jnp.float32)
               + bqkv_ref[...]).astype(cdt)            # (M, 3E)
        qh = qkv[:, :E].reshape(Nb, L, E)              # query already * 1/sqrt(dh)
        kh = qkv[:, E:2 * E].reshape(Nb, L, E)
        vh = qkv[:, 2 * E:].reshape(Nb, L, E)

        if not chunked:
            # Direct softmax fast path: full (Nb, L, L) f32 score tile in VMEM.
            s = jnp.einsum('bqd,bkd->bqk', qh, kh,
                           preferred_element_type=jnp.float32)
            m = jnp.max(s, axis=-1, keepdims=True)
            p = jnp.exp(s - m)
            l = jnp.sum(p, axis=-1, keepdims=True)
            o = jnp.einsum('bqk,bkd->bqd', p.astype(cdt), vh,
                           preferred_element_type=jnp.float32)
            if use_approx:
                o = o * pl.reciprocal(l, approx=True)  # EUP slot, frees VALU
            else:
                o = o / l
        else:
            # Chunked fallback: flash-style online softmax over key chunks.
            k_sc, v_sc = scratch
            k_sc[...] = kh
            v_sc[...] = vh
            kt = key_chunk
            n_chunks = L // kt

            m0 = jnp.full((Nb, L, 1), -jnp.inf, jnp.float32)
            l0 = jnp.zeros((Nb, L, 1), jnp.float32)
            a0 = jnp.zeros((Nb, L, E), jnp.float32)

            def chunk(c, carry):
                m, l, acc = carry
                start = pl.multiple_of(c * kt, kt)
                kc = k_sc[:, pl.ds(start, kt), :]      # (Nb, kt, E)
                vc = v_sc[:, pl.ds(start, kt), :]
                s = jnp.einsum('bqd,bkd->bqk', qh, kc,
                               preferred_element_type=jnp.float32)
                m_new = jnp.maximum(m, jnp.max(s, axis=-1, keepdims=True))
                alpha = jnp.exp(m - m_new)
                p = jnp.exp(s - m_new)
                l_new = alpha * l + jnp.sum(p, axis=-1, keepdims=True)
                acc_new = alpha * acc + jnp.einsum(
                    'bqk,bkd->bqd', p.astype(cdt), vc,
                    preferred_element_type=jnp.float32)
                return m_new, l_new, acc_new

            m, l, acc = lax.fori_loop(0, n_chunks, chunk, (m0, l0, a0),
                                      unroll=n_chunks <= 8)
            if use_approx:
                o = acc * pl.reciprocal(l, approx=True)
            else:
                o = acc / l

        # Output projection over the full width.
        o2 = o.reshape(M, E).astype(cdt)
        attn = (jnp.dot(o2, wo_ref[...], preferred_element_type=jnp.float32)
                + bo_ref[...])                          # (M, E) f32

        # Residual + InstanceNorm1d over the sequence axis (biased var) + ReLU,
        # all per batch row (axis 1 of the (Nb, L, E) view), in f32.
        y = x + attn.reshape(Nb, L, E)
        mean = jnp.mean(y, axis=1, keepdims=True)
        var = jnp.mean((y - mean) ** 2, axis=1, keepdims=True)
        y = (y - mean) * lax.rsqrt(var + eps)
        return jnp.maximum(y, 0.0)

    x0 = x_ref[...].astype(jnp.float32)
    # Layers share one weight set (_get_clones reuses a single module), so a
    # fori_loop over layers is exact; unroll short stacks for LLO visibility.
    x_out = lax.fori_loop(0, num_layers, layer, x0, unroll=num_layers <= 4)
    out_ref[...] = x_out.astype(out_ref.dtype)


def _vmem_limit_bytes():
    """Generation-aware compiler VMEM limit (~48 MiB on v7x, ~100 MiB on v5e/v6e)."""
    cap = 64 * 1024 * 1024          # conservative default (v7x per-core VMEM)
    try:
        info = pltpu.get_tpu_info()
        cap = int(getattr(info, "vmem_capacity_bytes", cap))
    except Exception:
        pass
    return int(min(cap - 16 * 1024 * 1024, 100 * 1024 * 1024))


def _block_vmem_bytes(nb, L, E, cbytes, chunked, kt):
    """Rough per-grid-step VMEM footprint estimate (bytes)."""
    m = nb * L
    io = 2 * 2 * nb * L * E * 4                      # in + out blocks, double-buffered
    w = 2 * (4 * E * E * cbytes + 4 * E * 4)         # (E,3E)+(E,E) weights + biases
    x_carry = nb * L * E * 4                         # f32 layer carry
    qkv = m * 3 * E * (4 + cbytes)                   # f32 matmul result + cdt copy
    if chunked:
        scratch = 2 * nb * L * E * cbytes            # k_sc + v_sc
        score = 2 * nb * L * kt * 4                  # s + p for one chunk
        acc = nb * L * E * 4 + 2 * nb * L * 4        # online-softmax carries
    else:
        scratch = 0
        score = 2 * nb * L * L * 4                   # s + p (full tile)
        acc = nb * L * E * 4
    proj = 2 * m * E * 4
    return io + w + x_carry + qkv + scratch + score + acc + proj


def _pick_batch_block(N, L, E, cbytes, chunked, kt, budget):
    """Largest divisor of N that fits VMEM while keeping >= 2 grid blocks (2 TCs)."""
    min_blocks = 2 if N >= 2 else 1
    for nb in range(N, 0, -1):
        if N % nb != 0 or N // nb < min_blocks:
            continue
        if _block_vmem_bytes(nb, L, E, cbytes, chunked, kt) <= budget:
            return nb
    return 1


def transformer_encoder(src_lne, params, *, num_layers, num_heads=1,
                        compute_dtype=jnp.bfloat16, attn_impl="auto",
                        key_chunk=512):
    """src_lne: (L, N, E) like the PyTorch module. Returns (L, N, E)."""
    L, N, E = src_lne.shape
    assert num_heads == 1, "Only support num_heads=1 (matches the PyTorch module)"
    wq, bq, wk, bk, wv, bv, wo, bo = params

    cdt = compute_dtype
    cbytes = jnp.dtype(cdt).itemsize
    vmem_limit = _vmem_limit_bytes()
    budget = int(0.75 * vmem_limit)                  # headroom for compiler temps

    # Attention plan: direct softmax whenever the full score tile fits VMEM;
    # chunked online-softmax only as a long-sequence fallback.
    if attn_impl == "direct":
        chunked = False
    elif attn_impl == "chunked":
        chunked = True
    else:
        chunked = _block_vmem_bytes(1, L, E, cbytes, False, L) > budget

    kt = L
    if chunked:
        kt = min(key_chunk, L)
        # Prefer a lane-dense chunk: largest multiple of 128 that divides L.
        cand = (kt // 128) * 128
        while cand >= 128 and L % cand != 0:
            cand -= 128
        if cand >= 128:
            kt = cand
        if L % kt != 0:
            chunked = False                          # no clean chunking; go direct
            kt = L

    Nb = _pick_batch_block(N, L, E, cbytes, chunked, kt, budget)
    n_blocks = N // Nb

    scale = 1.0 / float(E // num_heads) ** 0.5
    # Fused, pre-transposed QKV weight/bias; fold 1/sqrt(dh) into the q slice.
    wqkv_t = jnp.concatenate([(wq * scale).T, wk.T, wv.T], axis=1).astype(cdt)
    bqkv = jnp.concatenate([bq * scale, bk, bv]).reshape(1, 3 * E).astype(jnp.float32)
    wo_t = wo.T.astype(cdt)
    bo_2 = bo.reshape(1, E).astype(jnp.float32)

    x_nle = jnp.transpose(src_lne, (1, 0, 2))        # (N, L, E) batch-major

    kernel = functools.partial(_encoder_kernel, num_layers=num_layers,
                               key_chunk=kt, compute_dtype=cdt, chunked=chunked)

    act_spec = pl.BlockSpec((Nb, L, E), lambda n: (n, 0, 0))
    scratch_shapes = []
    if chunked:
        scratch_shapes = [pltpu.VMEM((Nb, L, E), cdt),
                          pltpu.VMEM((Nb, L, E), cdt)]

    out_nle = pl.pallas_call(
        kernel,
        grid=(n_blocks,),
        in_specs=[act_spec,
                  pl.BlockSpec((E, 3 * E), lambda n: (0, 0)),   # resident weights
                  pl.BlockSpec((1, 3 * E), lambda n: (0, 0)),
                  pl.BlockSpec((E, E), lambda n: (0, 0)),
                  pl.BlockSpec((1, E), lambda n: (0, 0))],
        out_specs=act_spec,
        out_shape=jax.ShapeDtypeStruct((N, L, E), src_lne.dtype),
        scratch_shapes=scratch_shapes,
        compiler_params=pltpu.CompilerParams(
            dimension_semantics=("parallel",),       # batch blocks across TCs
            vmem_limit_bytes=vmem_limit),
    )(x_nle, wqkv_t, bqkv, wo_t, bo_2)
    return jnp.transpose(out_nle, (1, 0, 2))         # back to (L, N, E)


def reference_encoder(src_lne, params, *, num_layers):
    """Pure-JAX reference mirroring the PyTorch forward (torch layout, H=1)."""
    wq, bq, wk, bk, wv, bv, wo, bo = params
    L, N, E = src_lne.shape
    scale = 1.0 / (E ** 0.5)
    x = src_lne.astype(jnp.float32)
    for _ in range(num_layers):
        q = x @ wq.T + bq
        k = x @ wk.T + bk
        v = x @ wv.T + bv
        qh = q.transpose(1, 0, 2) * scale            # (N, L, E)
        kh = k.transpose(1, 0, 2)
        vh = v.transpose(1, 0, 2)
        s = jnp.einsum('nqd,nkd->nqk', qh, kh)
        p = jax.nn.softmax(s, axis=-1)
        o = jnp.einsum('nqk,nkd->nqd', p, vh).transpose(1, 0, 2)  # (L, N, E)
        src2 = o @ wo.T + bo
        y = x + src2
        mean = y.mean(axis=0, keepdims=True)
        var = ((y - mean) ** 2).mean(axis=0, keepdims=True)
        y = (y - mean) / jnp.sqrt(var + 1e-5)
        x = jax.nn.relu(y)
    return x


if __name__ == "__main__":
    def make_case(key, L, N, E):
        keys = jax.random.split(key, 9)
        ws = 1.0 / (E ** 0.5)
        wq = jax.random.normal(keys[0], (E, E), jnp.float32) * ws
        wk = jax.random.normal(keys[1], (E, E), jnp.float32) * ws
        wv = jax.random.normal(keys[2], (E, E), jnp.float32) * ws
        wo = jax.random.normal(keys[3], (E, E), jnp.float32) * ws
        bq = jax.random.normal(keys[4], (E,), jnp.float32) * 0.01
        bk = jax.random.normal(keys[5], (E,), jnp.float32) * 0.01
        bv = jax.random.normal(keys[6], (E,), jnp.float32) * 0.01
        bo = jax.random.normal(keys[7], (E,), jnp.float32) * 0.01
        src = jax.random.normal(keys[8], (L, N, E), jnp.float32)
        return (wq, bq, wk, bk, wv, bv, wo, bo), src

    def check(out, ref, atol, rtol, tag):
        out32 = out.astype(jnp.float32)
        if not jnp.allclose(out32, ref, atol=atol, rtol=rtol):
            max_err = float(jnp.max(jnp.abs(out32 - ref)))
            raise AssertionError(f"kernel/reference mismatch ({tag}): "
                                 f"max abs err={max_err}")

    k1, k2 = jax.random.split(jax.random.PRNGKey(0))

    # Case 1: the module's own config (d_model=64, num_heads=1), 2 shared-weight
    # layers, small L/N.  Auto plan -> direct-softmax fast path, Nb per TC.
    L, N, E, n_layers = 16, 2, 64, 2
    params, src = make_case(k1, L, N, E)
    ref = reference_encoder(src, params, num_layers=n_layers)
    for cdt, atol, rtol in ((jnp.float32, 1e-3, 1e-3),   # tight check of the logic
                            (jnp.bfloat16, 1e-1, 1e-1)):  # perf config (bf16 + approx recip)
        out = transformer_encoder(src, params, num_layers=n_layers,
                                  compute_dtype=cdt)
        out = jax.block_until_ready(out)
        assert out.shape == (L, N, E)
        check(out, ref, atol, rtol, f"direct,{jnp.dtype(cdt).name}")

    # Case 2: exercise the chunked (online-softmax) fallback path explicitly.
    # (Tiny key_chunk is test-only; the auto planner uses >=128 lane-dense chunks.)
    params2, src2 = make_case(k2, L, N, E)
    ref2 = reference_encoder(src2, params2, num_layers=1)
    out2 = transformer_encoder(src2, params2, num_layers=1,
                               compute_dtype=jnp.float32,
                               attn_impl="chunked", key_chunk=8)
    out2 = jax.block_until_ready(out2)
    assert out2.shape == (L, N, E)
    check(out2, ref2, 1e-3, 1e-3, "chunked,float32")

    print("KERNEL_OK")
</pallas_src>

<mosaic_0001>
module attributes {stable_mosaic.version = 11 : i64} {
  func.func @_encoder_kernel(%arg0: i32, %arg1: memref<1x16x64xf32, #tpu.memory_space<vmem>>, %arg2: memref<64x192xf32, #tpu.memory_space<vmem>>, %arg3: memref<1x192xf32, #tpu.memory_space<vmem>>, %arg4: memref<64x64xf32, #tpu.memory_space<vmem>>, %arg5: memref<1x64xf32, #tpu.memory_space<vmem>>, %arg6: memref<1x16x64xf32, #tpu.memory_space<vmem>>) attributes {dimension_semantics = [#tpu.dimension_semantics<parallel>], iteration_bounds = array<i64: 2>, scalar_prefetch = 0 : i64, scratch_operands = 0 : i64, tpu.core_type = #tpu.core_type<tc>, window_params = [{transform_indices = @transform_0, window_bounds = array<i64: 1, 16, 64>}, {pipeline_mode = #tpu.pipeline_mode<synchronous>, transform_indices = @transform_1, window_bounds = array<i64: 64, 192>}, {pipeline_mode = #tpu.pipeline_mode<synchronous>, transform_indices = @transform_2, window_bounds = array<i64: 1, 192>}, {pipeline_mode = #tpu.pipeline_mode<synchronous>, transform_indices = @transform_3, window_bounds = array<i64: 64, 64>}, {pipeline_mode = #tpu.pipeline_mode<synchronous>, transform_indices = @transform_4, window_bounds = array<i64: 1, 64>}, {transform_indices = @transform_5, window_bounds = array<i64: 1, 16, 64>}]} {
    %c0 = arith.constant 0 : index
    %c0_0 = arith.constant 0 : index
    %c0_1 = arith.constant 0 : index
    %0 = vector.load %arg1[%c0, %c0_0, %c0_1] : memref<1x16x64xf32, #tpu.memory_space<vmem>>, vector<1x16x64xf32>
    %c0_i32 = arith.constant 0 : i32
    %1 = vector.shape_cast %0 : vector<1x16x64xf32> to vector<16x64xf32>
    %c0_2 = arith.constant 0 : index
    %c0_3 = arith.constant 0 : index
    %2 = vector.load %arg2[%c0_2, %c0_3] : memref<64x192xf32, #tpu.memory_space<vmem>>, vector<64x192xf32>
    %cst = arith.constant dense<0.000000e+00> : vector<16x192xf32>
    %3 = tpu.matmul %1, %2, %cst {dimension_numbers = #tpu.dot_dimension_numbers<[1], [0], [0], [1], [0, 0, 1, 1], [], []>} : vector<16x64xf32>, vector<64x192xf32>, vector<16x192xf32> -> vector<16x192xf32>
    %c0_4 = arith.constant 0 : index
    %c0_5 = arith.constant 0 : index
    %4 = vector.load %arg3[%c0_4, %c0_5] : memref<1x192xf32, #tpu.memory_space<vmem>>, vector<1x192xf32>
    %5 = vector.broadcast %4 : vector<1x192xf32> to vector<16x192xf32>
    %6 = arith.addf %3, %5 : vector<16x192xf32>
    %7 = vector.extract_strided_slice %6 {offsets = [0, 0], sizes = [16, 64], strides = [1, 1]} : vector<16x192xf32> to vector<16x64xf32>
    %8 = vector.shape_cast %7 : vector<16x64xf32> to vector<1x16x64xf32>
    %9 = vector.extract_strided_slice %6 {offsets = [0, 64], sizes = [16, 64], strides = [1, 1]} : vector<16x192xf32> to vector<16x64xf32>
    %10 = vector.shape_cast %9 : vector<16x64xf32> to vector<1x16x64xf32>
    %11 = vector.extract_strided_slice %6 {offsets = [0, 128], sizes = [16, 64], strides = [1, 1]} : vector<16x192xf32> to vector<16x64xf32>
    %12 = vector.shape_cast %11 : vector<16x64xf32> to vector<1x16x64xf32>
    "tpu.trace_start"() <{level = 10 : i32, message = "bqd,bkd->bqk"}> : () -> ()
    %cst_6 = arith.constant dense<0.000000e+00> : vector<1x16x16xf32>
    %13 = tpu.matmul %8, %10, %cst_6 {dimension_numbers = #tpu.dot_dimension_numbers<[2], [2], [1], [1], [0, 0, 0, 1, 1, 1], [0], [0]>} : vector<1x16x64xf32>, vector<1x16x64xf32>, vector<1x16x16xf32> -> vector<1x16x16xf32>
    "tpu.trace_stop"() : () -> ()
    %cst_7 = arith.constant dense<0xFF800000> : vector<1x16xf32>
    %14 = vector.multi_reduction <maximumf>, %13, %cst_7 [2] : vector<1x16x16xf32> to vector<1x16xf32>
    %15 = vector.shape_cast %14 : vector<1x16xf32> to vector<1x16x1xf32>
    %16 = vector.broadcast %15 : vector<1x16x1xf32> to vector<1x16x16xf32>
    %17 = arith.subf %13, %16 : vector<1x16x16xf32>
    %18 = math.exp %17 : vector<1x16x16xf32>
    %cst_8 = arith.constant dense<0.000000e+00> : vector<1x16xf32>
    %19 = vector.multi_reduction <add>, %18, %cst_8 [2] : vector<1x16x16xf32> to vector<1x16xf32>
    %20 = vector.shape_cast %19 : vector<1x16xf32> to vector<1x16x1xf32>
    "tpu.trace_start"() <{level = 10 : i32, message = "bqk,bkd->bqd"}> : () -> ()
    %cst_9 = arith.constant dense<0.000000e+00> : vector<1x16x64xf32>
    %21 = tpu.matmul %18, %12, %cst_9 {dimension_numbers = #tpu.dot_dimension_numbers<[2], [1], [1], [2], [0, 0, 0, 1, 1, 2], [0], [0]>} : vector<1x16x16xf32>, vector<1x16x64xf32>, vector<1x16x64xf32> -> vector<1x16x64xf32>
    "tpu.trace_stop"() : () -> ()
    %22 = vector.broadcast %20 : vector<1x16x1xf32> to vector<1x16x64xf32>
    %23 = arith.divf %21, %22 : vector<1x16x64xf32>
    %24 = vector.shape_cast %23 : vector<1x16x64xf32> to vector<16x64xf32>
    %c0_10 = arith.constant 0 : index
    %c0_11 = arith.constant 0 : index
    %25 = vector.load %arg4[%c0_10, %c0_11] : memref<64x64xf32, #tpu.memory_space<vmem>>, vector<64x64xf32>
    %cst_12 = arith.constant dense<0.000000e+00> : vector<16x64xf32>
    %26 = tpu.matmul %24, %25, %cst_12 {dimension_numbers = #tpu.dot_dimension_numbers<[1], [0], [0], [1], [0, 0, 1, 1], [], []>} : vector<16x64xf32>, vector<64x64xf32>, vector<16x64xf32> -> vector<16x64xf32>
    %c0_13 = arith.constant 0 : index
    %c0_14 = arith.constant 0 : index
    %27 = vector.load %arg5[%c0_13, %c0_14] : memref<1x64xf32, #tpu.memory_space<vmem>>, vector<1x64xf32>
    %28 = vector.broadcast %27 : vector<1x64xf32> to vector<16x64xf32>
    %29 = arith.addf %26, %28 : vector<16x64xf32>
    %30 = vector.shape_cast %29 : vector<16x64xf32> to vector<1x16x64xf32>
    %31 = arith.addf %0, %30 : vector<1x16x64xf32>
    %cst_15 = arith.constant dense<0.000000e+00> : vector<1x64xf32>
    %32 = vector.multi_reduction <add>, %31, %cst_15 [1] : vector<1x16x64xf32> to vector<1x64xf32>
    %33 = vector.shape_cast %32 : vector<1x64xf32> to vector<1x1x64xf32>
    %cst_16 = arith.constant 1.600000e+01 : f32
    %34 = vector.broadcast %cst_16 : f32 to vector<1x1x64xf32>
    %35 = arith.divf %33, %34 : vector<1x1x64xf32>
    %36 = vector.broadcast %35 : vector<1x1x64xf32> to vector<1x16x64xf32>
    %37 = arith.subf %31, %36 : vector<1x16x64xf32>
    %38 = arith.mulf %37, %37 : vector<1x16x64xf32>
    %cst_17 = arith.constant dense<0.000000e+00> : vector<1x64xf32>
    %39 = vector.multi_reduction <add>, %38, %cst_17 [1] : vector<1x16x64xf32> to vector<1x64xf32>
    %40 = vector.shape_cast %39 : vector<1x64xf32> to vector<1x1x64xf32>
    %cst_18 = arith.constant 1.600000e+01 : f32
    %41 = vector.broadcast %cst_18 : f32 to vector<1x1x64xf32>
    %42 = arith.divf %40, %41 : vector<1x1x64xf32>
    %43 = vector.broadcast %35 : vector<1x1x64xf32> to vector<1x16x64xf32>
    %44 = arith.subf %31, %43 : vector<1x16x64xf32>
    %cst_19 = arith.constant 9.99999974E-6 : f32
    %45 = vector.broadcast %cst_19 : f32 to vector<1x1x64xf32>
    %46 = arith.addf %42, %45 : vector<1x1x64xf32>
    %47 = math.rsqrt %46 : vector<1x1x64xf32>
    %48 = vector.broadcast %47 : vector<1x1x64xf32> to vector<1x16x64xf32>
    %49 = arith.mulf %44, %48 : vector<1x16x64xf32>
    %cst_20 = arith.constant 0.000000e+00 : f32
    %50 = vector.broadcast %cst_20 : f32 to vector<1x16x64xf32>
    %51 = arith.maximumf %49, %50 : vector<1x16x64xf32>
    %c1_i32 = arith.constant 1 : i32
    %52 = vector.shape_cast %51 : vector<1x16x64xf32> to vector<16x64xf32>
    %c0_21 = arith.constant 0 : index
    %c0_22 = arith.constant 0 : index
    %53 = vector.load %arg2[%c0_21, %c0_22] : memref<64x192xf32, #tpu.memory_space<vmem>>, vector<64x192xf32>
    %cst_23 = arith.constant dense<0.000000e+00> : vector<16x192xf32>
    %54 = tpu.matmul %52, %53, %cst_23 {dimension_numbers = #tpu.dot_dimension_numbers<[1], [0], [0], [1], [0, 0, 1, 1], [], []>} : vector<16x64xf32>, vector<64x192xf32>, vector<16x192xf32> -> vector<16x192xf32>
    %c0_24 = arith.constant 0 : index
    %c0_25 = arith.constant 0 : index
    %55 = vector.load %arg3[%c0_24, %c0_25] : memref<1x192xf32, #tpu.memory_space<vmem>>, vector<1x192xf32>
    %56 = vector.broadcast %55 : vector<1x192xf32> to vector<16x192xf32>
    %57 = arith.addf %54, %56 : vector<16x192xf32>
    %58 = vector.extract_strided_slice %57 {offsets = [0, 0], sizes = [16, 64], strides = [1, 1]} : vector<16x192xf32> to vector<16x64xf32>
    %59 = vector.shape_cast %58 : vector<16x64xf32> to vector<1x16x64xf32>
    %60 = vector.extract_strided_slice %57 {offsets = [0, 64], sizes = [16, 64], strides = [1, 1]} : vector<16x192xf32> to vector<16x64xf32>
    %61 = vector.shape_cast %60 : vector<16x64xf32> to vector<1x16x64xf32>
    %62 = vector.extract_strided_slice %57 {offsets = [0, 128], sizes = [16, 64], strides = [1, 1]} : vector<16x192xf32> to vector<16x64xf32>
    %63 = vector.shape_cast %62 : vector<16x64xf32> to vector<1x16x64xf32>
    "tpu.trace_start"() <{level = 10 : i32, message = "bqd,bkd->bqk"}> : () -> ()
    %cst_26 = arith.constant dense<0.000000e+00> : vector<1x16x16xf32>
    %64 = tpu.matmul %59, %61, %cst_26 {dimension_numbers = #tpu.dot_dimension_numbers<[2], [2], [1], [1], [0, 0, 0, 1, 1, 1], [0], [0]>} : vector<1x16x64xf32>, vector<1x16x64xf32>, vector<1x16x16xf32> -> vector<1x16x16xf32>
    "tpu.trace_stop"() : () -> ()
    %cst_27 = arith.constant dense<0xFF800000> : vector<1x16xf32>
    %65 = vector.multi_reduction <maximumf>, %64, %cst_27 [2] : vector<1x16x16xf32> to vector<1x16xf32>
    %66 = vector.shape_cast %65 : vector<1x16xf32> to vector<1x16x1xf32>
    %67 = vector.broadcast %66 : vector<1x16x1xf32> to vector<1x16x16xf32>
    %68 = arith.subf %64, %67 : vector<1x16x16xf32>
    %69 = math.exp %68 : vector<1x16x16xf32>
    %cst_28 = arith.constant dense<0.000000e+00> : vector<1x16xf32>
    %70 = vector.multi_reduction <add>, %69, %cst_28 [2] : vector<1x16x16xf32> to vector<1x16xf32>
    %71 = vector.shape_cast %70 : vector<1x16xf32> to vector<1x16x1xf32>
    "tpu.trace_start"() <{level = 10 : i32, message = "bqk,bkd->bqd"}> : () -> ()
    %cst_29 = arith.constant dense<0.000000e+00> : vector<1x16x64xf32>
    %72 = tpu.matmul %69, %63, %cst_29 {dimension_numbers = #tpu.dot_dimension_numbers<[2], [1], [1], [2], [0, 0, 0, 1, 1, 2], [0], [0]>} : vector<1x16x16xf32>, vector<1x16x64xf32>, vector<1x16x64xf32> -> vector<1x16x64xf32>
    "tpu.trace_stop"() : () -> ()
    %73 = vector.broadcast %71 : vector<1x16x1xf32> to vector<1x16x64xf32>
    %74 = arith.divf %72, %73 : vector<1x16x64xf32>
    %75 = vector.shape_cast %74 : vector<1x16x64xf32> to vector<16x64xf32>
    %c0_30 = arith.constant 0 : index
    %c0_31 = arith.constant 0 : index
    %76 = vector.load %arg4[%c0_30, %c0_31] : memref<64x64xf32, #tpu.memory_space<vmem>>, vector<64x64xf32>
    %cst_32 = arith.constant dense<0.000000e+00> : vector<16x64xf32>
    %77 = tpu.matmul %75, %76, %cst_32 {dimension_numbers = #tpu.dot_dimension_numbers<[1], [0], [0], [1], [0, 0, 1, 1], [], []>} : vector<16x64xf32>, vector<64x64xf32>, vector<16x64xf32> -> vector<16x64xf32>
    %c0_33 = arith.constant 0 : index
    %c0_34 = arith.constant 0 : index
    %78 = vector.load %arg5[%c0_33, %c0_34] : memref<1x64xf32, #tpu.memory_space<vmem>>, vector<1x64xf32>
    %79 = vector.broadcast %78 : vector<1x64xf32> to vector<16x64xf32>
    %80 = arith.addf %77, %79 : vector<16x64xf32>
    %81 = vector.shape_cast %80 : vector<16x64xf32> to vector<1x16x64xf32>
    %82 = arith.addf %51, %81 : vector<1x16x64xf32>
    %cst_35 = arith.constant dense<0.000000e+00> : vector<1x64xf32>
    %83 = vector.multi_reduction <add>, %82, %cst_35 [1] : vector<1x16x64xf32> to vector<1x64xf32>
    %84 = vector.shape_cast %83 : vector<1x64xf32> to vector<1x1x64xf32>
    %cst_36 = arith.constant 1.600000e+01 : f32
    %85 = vector.broadcast %cst_36 : f32 to vector<1x1x64xf32>
    %86 = arith.divf %84, %85 : vector<1x1x64xf32>
    %87 = vector.broadcast %86 : vector<1x1x64xf32> to vector<1x16x64xf32>
    %88 = arith.subf %82, %87 : vector<1x16x64xf32>
    %89 = arith.mulf %88, %88 : vector<1x16x64xf32>
    %cst_37 = arith.constant dense<0.000000e+00> : vector<1x64xf32>
    %90 = vector.multi_reduction <add>, %89, %cst_37 [1] : vector<1x16x64xf32> to vector<1x64xf32>
    %91 = vector.shape_cast %90 : vector<1x64xf32> to vector<1x1x64xf32>
    %cst_38 = arith.constant 1.600000e+01 : f32
    %92 = vector.broadcast %cst_38 : f32 to vector<1x1x64xf32>
    %93 = arith.divf %91, %92 : vector<1x1x64xf32>
    %94 = vector.broadcast %86 : vector<1x1x64xf32> to vector<1x16x64xf32>
    %95 = arith.subf %82, %94 : vector<1x16x64xf32>
    %cst_39 = arith.constant 9.99999974E-6 : f32
    %96 = vector.broadcast %cst_39 : f32 to vector<1x1x64xf32>
    %97 = arith.addf %93, %96 : vector<1x1x64xf32>
    %98 = math.rsqrt %97 : vector<1x1x64xf32>
    %99 = vector.broadcast %98 : vector<1x1x64xf32> to vector<1x16x64xf32>
    %100 = arith.mulf %95, %99 : vector<1x16x64xf32>
    %cst_40 = arith.constant 0.000000e+00 : f32
    %101 = vector.broadcast %cst_40 : f32 to vector<1x16x64xf32>
    %102 = arith.maximumf %100, %101 : vector<1x16x64xf32>
    %c0_41 = arith.constant 0 : index
    %c0_42 = arith.constant 0 : index
    %c0_43 = arith.constant 0 : index
    %103 = vector.load %arg6[%c0_41, %c0_42, %c0_43] : memref<1x16x64xf32, #tpu.memory_space<vmem>>, vector<1x16x64xf32>
    tpu.vector_store %arg6[%c0_41, %c0_42, %c0_43], %102 {strides = array<i32>} : memref<1x16x64xf32, #tpu.memory_space<vmem>>, vector<1x16x64xf32>,
    return
  }
  func.func @transform_0(%arg0: i32) -> (i32, i32, i32) {
    %c0_i32 = arith.constant 0 : i32
    %c0_i32_0 = arith.constant 0 : i32
    %c0_i32_1 = arith.constant 0 : i32
    return %arg0, %c0_i32, %c0_i32_0 : i32, i32, i32
  }
  func.func @transform_1(%arg0: i32) -> (i32, i32) {
    %c0_i32 = arith.constant 0 : i32
    %c0_i32_0 = arith.constant 0 : i32
    %c0_i32_1 = arith.constant 0 : i32
    return %c0_i32, %c0_i32_0 : i32, i32
  }
  func.func @transform_2(%arg0: i32) -> (i32, i32) {
    %c0_i32 = arith.constant 0 : i32
    %c0_i32_0 = arith.constant 0 : i32
    %c0_i32_1 = arith.constant 0 : i32
    return %c0_i32, %c0_i32_0 : i32, i32
  }
  func.func @transform_3(%arg0: i32) -> (i32, i32) {
    %c0_i32 = arith.constant 0 : i32
    %c0_i32_0 = arith.constant 0 : i32
    %c0_i32_1 = arith.constant 0 : i32
    return %c0_i32, %c0_i32_0 : i32, i32
  }
  func.func @transform_4(%arg0: i32) -> (i32, i32) {
    %c0_i32 = arith.constant 0 : i32
    %c0_i32_0 = arith.constant 0 : i32
    %c0_i32_1 = arith.constant 0 : i32
    return %c0_i32, %c0_i32_0 : i32, i32
  }
  func.func @transform_5(%arg0: i32) -> (i32, i32, i32) {
    %c0_i32 = arith.constant 0 : i32
    %c0_i32_0 = arith.constant 0 : i32
    %c0_i32_1 = arith.constant 0 : i32
    return %arg0, %c0_i32, %c0_i32_0 : i32, i32, i32
  }
}

</mosaic_0001>

<bundles_post_ra>
// kernel: tpu_custom_call.1
= control target key start
LH: loop header
LB: loop body
LE: loop exit
PB: predicated region body
PF: predicated region fallthrough
CT: control target
= control target key end

     0   :  { %10 = vsyncpa [#allocation3], 0  ;;  %s2131_s0 = inlined_call_operand.hbm [shape: f32[2,16,64], index: 0, kind: input, shape index: {}]   ;;  %s2132_s1 = inlined_call_operand.hbm [shape: f32[64,192], index: 1, kind: input, shape index: {}]   ;;  %s2133_s2 = inlined_call_operand.vmem [shape: f32[1,192], index: 2, kind: input, shape index: {}]   ;;  %s2134_s3 = inlined_call_operand.hbm [shape: f32[64,64], index: 3, kind: input, shape index: {}]   ;;  %s2135_s4 = inlined_call_operand.vmem [shape: f32[1,64], index: 4, kind: input, shape index: {}]   ;;  %s2136_s5 = inlined_call_operand.hbm [shape: f32[2,16,64], index: 5, kind: output, shape index: {}]  }
   0x1   :  { %12 = vsyncpa [#allocation3 + $0x1], 0 }
   0x2   :  { %13 = vsyncpa [#allocation6], 0 }
   0x3   :  { %14 = vsyncpa [#allocation4], 0 }
   0x4   :  { %16 = vsyncpa [#allocation4 + $0x1], 0  ;;  %s1780_s18 = smov 0   ;;  %s1782_s19 = smov 0  }
   0x5   :  { %s1784_s20 = smov 0   ;;  %s1786_s21 = smov 0  }
   0x6 LB: > { %s1801_s22 = sadd.s32 4294967295, %s1736_s21   ;;  %s1247_s23 = sadd.s32 4294967294, %s1736_s21   ;;  %s1736_s21 = sphi %s1786_s21, %s2158_s21   ;;  %s1732_s20 = sphi %s1784_s20, %s2157_s20   ;;  %s1728_s19 = sphi %s1782_s19, %s2156_s19   ;;  %s1724_s18 = sphi %s1780_s18, %s2155_s18  }
   0x7   : > { %p42_p0 = scmp.ne.s32.totalorder %s1728_s19, %s1724_s18  ;;  %p2137_p1 = scmp.eq.s32.totalorder %s1801_s22, 0 }
   0x8   : > { %p156_p3 = scmp.eq.s32.totalorder %s1247_s23, 1  ;;  %p1248_p5 = scmp.ge.s32.totalorder %s1736_s21, 1 }
   0x9   : > { %p1810_p4 = por %p2137_p1, %p42_p0  ;;  %p163_p7 = scmp.lt.s32.totalorder %s1736_s21, 3 }
   0xa   : > { %p1815_p6 = por %p156_p3, %p42_p0  ;;  %s1738_s27 = smov [#allocation5]  }
   0xb   : > { %s2140_s24 = scalar_select %p1810_p4, 1, 0 }
   0xc   : > { %s2141_s25 = scalar_select %p1815_p6, 1, 0 }
   0xd   : > { %p1820_p8 = pnand %p1248_p5, %p163_p7  ;;  %s175_s28 = sshll.u32 %s1738_s27, 4  ;;  %s1824_s28 = int_to_ptr.vmem [resolvable:$true] %s175_s28 }
   0xe   : > { %s1739_s30 = smov [#allocation7]   ;;  %s1580_s9 = scalar_lea.hbm %s2132_s1, 2048 }
   0xf   : > { %p1487_p9 = pneg %p1820_p8  ;;  %s191_s6 = sshll.u32 %s1739_s30, 4  ;;  %s1835_s6 = int_to_ptr.vmem [resolvable:$true] %s191_s6 }
  0x10   : > { %p1581_p12 = scmp.ne.s32.totalorder %s2132_s1, %s1580_s9  ;;  %p1587_p5 = scmp.lt.u32.totalorder %s1580_s9, %s2132_s1 }
  0x11   : > { %p1831_p11 = pnand %p1487_p9, %p2137_p1 }
  0x13   : > { %p1582_p13 = pneg %p1831_p11 }
  0x15   : > { %p1583_p0 = pnand %p1582_p13, %p1581_p12 }
  0x17   : > { %p1584_p3 = pneg %p1583_p0 }
  0x19   : > { %p1589_p7 = pnand %p1587_p5, %p1584_p3 }
  0x1b   : > { %1592 = shalt.err (!%p1589_p7)
}
  0x1c   : > { %s1593_s14 = scalar_lea.vmem %s1824_s28, 2048  ;;  %p1601_p2 = scmp.lt.s32.totalorder %s1824_s28, %s1824_s28 }
  0x1d   : > { %p1594_p9 = scmp.ne.s32.totalorder %s1824_s28, %s1593_s14  ;;  %p1602_p12 = scmp.lt.s32.totalorder %s1593_s14, %s1593_s14 }
  0x1f   : > { %p1596_p10 = pnand %p1594_p9, %p1582_p13  ;;  %p1603_p0 = por %p1602_p12, %p1601_p2 }
  0x21   : > { %p1597_p1 = pneg %p1596_p10 }
  0x23   : > { %p1604_p6 = pnand %p1603_p0, %p1597_p1 }
  0x25   : > { %1607 = shalt.err (!%p1604_p6)
}
  0x26   : > { %s1740_s15 = smov 256   ;;  %s1741_s16 = smov 16  }
  0x27   : > { %1490 = dma.hbm_to_vmem [thread:$0]  (!%p1831_p11), %s2132_s1, 2048, %s1824_s28, [#allocation6], %s1740_s15, %s1740_s15, %s1741_s16  }
  0x28   : > { %s1608_s7 = scalar_lea.hbm %s2134_s3, 1024 }
  0x29   : > { %p1609_p2 = scmp.ne.s32.totalorder %s2134_s3, %s1608_s7  ;;  %p1615_p10 = scmp.lt.u32.totalorder %s1608_s7, %s2134_s3 }
  0x2b   : > { %p1611_p1 = pnand %p1609_p2, %p1582_p13 }
  0x2d   : > { %p1612_p6 = pneg %p1611_p1 }
  0x2f   : > { %p1617_p3 = pnand %p1615_p10, %p1612_p6 }
  0x31   : > { %1620 = shalt.err (!%p1617_p3)
}
  0x32   : > { %s1621_s28 = scalar_lea.vmem %s1835_s6, 1024  ;;  %p1629_p12 = scmp.lt.s32.totalorder %s1835_s6, %s1835_s6 }
  0x33   : > { %p1622_p5 = scmp.ne.s32.totalorder %s1835_s6, %s1621_s28  ;;  %p1630_p0 = scmp.lt.s32.totalorder %s1621_s28, %s1621_s28 }
  0x35   : > { %p1624_p7 = pnand %p1622_p5, %p1582_p13  ;;  %p1631_p2 = por %p1630_p0, %p1629_p12 }
  0x37   : > { %p1625_p9 = pneg %p1624_p7 }
  0x39   : > { %p1632_p1 = pnand %p1631_p2, %p1625_p9 }
  0x3b   : > { %1635 = shalt.err (!%p1632_p1)
}
  0x3c   : > { %s1742_s12 = smov 128   ;;  %s1743_s13 = smov 8  }
  0x3d   : > { %1493 = dma.hbm_to_vmem [thread:$0]  (!%p1831_p11), %s2134_s3, 1024, %s1835_s6, [#allocation6], %s1742_s12, %s1742_s12, %s1743_s13  }
  0x3e   : > { %s1893_s16 = sadd.s32 1, %s1736_s21   ;;  %s29_s23 = sadd.s32 1, %s1732_s20 }
  0x3f   : > { %s26_s17 = ssub.s32 %s1736_s21, %s1893_s16  ;;  %p36_p6 = scmp.ne.s32.totalorder %s1732_s20, %s1728_s19 }
  0x40   : > { %p27_p13 = scmp.eq.s32.totalorder %s26_s17, 0  ;;  %p37_p10 = scmp.eq.s32.totalorder %s1736_s21, 0 }
  0x41   : > { %p2144_p5 = scmp.eq.s32.totalorder %s1801_s22, 1  ;;  %p1504_p9 = scmp.lt.s32.totalorder %s1736_s21, 2 }
  0x42   : > { %s1902_s27 = scalar_select %p27_p13, %s1732_s20, %s29_s23  }
  0x43   : > { %p38_p3 = por %p37_p10, %p36_p6  ;;  %p1906_p7 = por %p2144_p5, %p36_p6 }
  0x44   : > { %s208_s30 = sand.u32 1, %s1732_s20   ;;  %s1287_s6 = sshll.u32 %s1736_s21, 8 }
  0x45   : > { %s2145_s29 = scalar_select %p1906_p7, 1, 0 }
  0x46   : > { %s1252_s7 = sshll.u32 %s208_s30, 4  ;;  %s1916_s10 = scalar_lea.hbm %s2131_s0, %s1287_s6 }
  0x47   : > { %s212_s11 = scalar_lea.vmem [#allocation2], %s1252_s7  ;;  %p1920_p11 = pnand %p1504_p9, %p38_p3 }
  0x48   : > { %s219_s28 = sshll.u32 %s212_s11, 4  ;;  %s1924_s15 = scalar_lea.sflag [#allocation3], %s208_s30  ;;  %s1918_s28 = int_to_ptr.vmem [resolvable:$true] %s219_s28 }
  0x49   : > { %s1636_s17 = scalar_lea.hbm %s1916_s10, 256  ;;  %p1638_p0 = pneg %p1920_p11 }
  0x4a   : > { %p1637_p12 = scmp.ne.s32.totalorder %s1916_s10, %s1636_s17  ;;  %s1641_s6 = scalar_lea.hbm %s2131_s0, 512 }
  0x4b   : > { %p1642_p13 = scmp.lt.u32.totalorder %s1916_s10, %s2131_s0  ;;  %p1643_p6 = scmp.lt.u32.totalorder %s1641_s6, %s1636_s17 }
  0x4c   : > { %p1639_p2 = pnand %p1638_p0, %p1637_p12  ;;  %p1645_p3 = scmp.lt.u32.totalorder %s1636_s17, %s1916_s10 }
  0x4d   : > { %p1644_p10 = por %p1643_p6, %p1642_p13 }
  0x4e   : > { %p1640_p1 = pneg %p1639_p2 }
  0x4f   : > { %p1646_p5 = por %p1645_p3, %p1644_p10 }
  0x51   : > { %p1647_p9 = pnand %p1646_p5, %p1640_p1 }
  0x53   : > { %1650 = shalt.err (!%p1647_p9)
}
  0x54   : > { %s1651_s30 = scalar_lea.vmem %s1918_s28, 256  ;;  %s1744_s11 = smov [#allocation2]  }
  0x55   : > { %p1652_p12 = scmp.ne.s32.totalorder %s1918_s28, %s1651_s30  ;;  %s1656_s23 = sshll.u32 %s1744_s11, 4  ;;  %s1657_s23 = int_to_ptr.vmem [resolvable:$false] %s1656_s23 }
  0x56   : > { %s1658_s7 = scalar_lea.vmem %s1657_s23, 512  ;;  %p1659_p4 = scmp.lt.s32.totalorder %s1918_s28, %s1657_s23 }
  0x57   : > { %p1654_p2 = pnand %p1652_p12, %p1638_p0  ;;  %p1660_p13 = scmp.lt.s32.totalorder %s1658_s7, %s1651_s30 }
  0x59   : > { %p1655_p7 = pneg %p1654_p2  ;;  %p1661_p6 = por %p1660_p13, %p1659_p4 }
  0x5b   : > { %p1662_p10 = pnand %p1661_p6, %p1655_p7 }
  0x5d   : > { %1665 = shalt.err (!%p1662_p10)
}
  0x5e   : > { %1497 = dma.hbm_to_vmem [thread:$0]  (!%p1920_p11), %s1916_s10, 256, %s1918_s28, %s1924_s15, %s1742_s12, %s1742_s12, %s1743_s13  }
  0x5f   : > { %231 = sbr.rel (%p1820_p8) target bundleno = 2554 (0x9fa), region = 40  ;;  %s1958_s17 = sand.u32 (!%p1820_p8), 1, %s1728_s19  }
  0x60   : > { %s1256_s6 = sshll.u32 (!%p1820_p8), %s1958_s17, 4  ;;  %s234_s8 = scalar_lea.sflag (!%p1820_p8), [#allocation3], %s1958_s17 }
  0x61   : > { %s1964_s14 = scalar_lea.vmem (!%p1820_p8), [#allocation2], %s1256_s6  ;;  %p2147_p4 = scmp.ne.s32.totalorder (!%p1820_p8), %s2140_s24, 0 }
  0x66   : > { %1711 = dma.done.wait (%p2147_p4), %s234_s8, 256  }
  0x67   : > { %1713 = vsyncadd (%p2147_p4), %s234_s8, 4294967040  ;;  %p2148_p7 = scmp.eq.s32.totalorder %s1801_s22, 0 }
  0x69   : > { %1715 = dma.done.wait (%p2148_p7), [#allocation6], 3072   ;;  %p2149_p8 = pmov %p2148_p7 }
  0x6a   : > { %v1745_v0 = vmov 0.0   ;;  %v275_v1 = vld [vmem:[#allocation5 + $0x8] sm:$0xff]  ;;  %v277_v2 = vld [vmem:[#allocation5 + $0x18] sm:$0xff]  ;;  %v274_v3 = vld [vmem:[#allocation5] sm:$0xff]  ;;  %vm302_vm0 = vcmask 523264   ;;  %v292_v27 = vlaneseq  ;;  %s1746_s12 = smov 64  }
  0x6b   : > { %1717 = vsyncadd (%p2149_p8), [#allocation6], 4294964224  ;;  %373 = vmatprep.mubr.f32.mxu0 %v1745_v0  ;;  %v1391_v4 = vpack.c.bf16 %v277_v2, %v275_v1  ;;  %v276_v5 = vld [vmem:[#allocation5 + $0x10] sm:$0xff]  ;;  %v279_v6 = vld [vmem:[#allocation5 + $0x28] sm:$0xff]  ;;  %vm475_vm2 = vcmask 130048   ;;  %s1288_s9 = sshll.u32 %s1801_s22, 8 }
  0x6c   : > { %v281_v7 = vld [vmem:[#allocation5 + $0x38] sm:$0xff]  ;;  %v1393_v8 = vpack.c.bf16 %v276_v5, %v274_v3  ;;  %v278_v10 = vld [vmem:[#allocation5 + $0x20] sm:$0xff]  ;;  %v280_v11 = vld [vmem:[#allocation5 + $0x30] sm:$0xff]  ;;  %v1987_v28 = vshrl.u32 %v292_v27, 7  ;;  %s271_s30 = scalar_lea.vmem [#allocation8], %s1256_s6  ;;  %s2083_s8 = scalar_lea.hbm %s2136_s5, %s1288_s9 }
  0x6d   : > { %v1395_v9 = vpack.c.bf16 %v281_v7, %v279_v6  ;;  %v283_v12 = vld [vmem:[#allocation5 + $0x48] sm:$0xff]  ;;  %1392 = vmatprep.subr.bf16.mxu0 %v1391_v4  ;;  %v285_v13 = vld [vmem:[#allocation5 + $0x58] sm:$0xff]  ;;  %v1397_v14 = vpack.c.bf16 %v280_v11, %v278_v10  ;;  %v282_v16 = vld [vmem:[#allocation5 + $0x40] sm:$0xff]  ;;  %s1155_s11 = sshll.u32 %s271_s30, 4  ;;  %s1142_s22 = scalar_lea.sflag [#allocation4], %s1958_s17  ;;  %s2085_s11 = int_to_ptr.vmem [resolvable:$true] %s1155_s11 }
  0x6e   : > { %1394 = vmatpush1.bf16.msra.mxu0 %v1393_v8  ;;  %v1399_v15 = vpack.c.bf16 %v285_v13, %v283_v12  ;;  %v284_v17 = vld [vmem:[#allocation5 + $0x50] sm:$0xff]  ;;  %v287_v18 = vld [vmem:[#allocation5 + $0x68] sm:$0xff]  ;;  %v289_v19 = vld [vmem:[#allocation5 + $0x78] sm:$0xff]  ;;  %v294_v29 = vsub.s32 0, %v1987_v28  ;;  %v298_v32 = vsub.s32 1, %v1987_v28  ;;  %s1666_s6 = scalar_lea.vmem %s2085_s11, 256 }
  0x6f   : > { %1396 = vmatprep.subr.bf16.mxu0 %v1395_v9  ;;  %v1401_v20 = vpack.c.bf16 %v284_v17, %v282_v16  ;;  %v1403_v21 = vpack.c.bf16 %v289_v19, %v287_v18  ;;  %v286_v22 = vld [vmem:[#allocation5 + $0x60] sm:$0xff]  ;;  %v288_v23 = vld [vmem:[#allocation5 + $0x70] sm:$0xff]  ;;  %v1982_v26 = vld [vmem:[%s1964_s14 + $0x8] sm:$0xff]  ;;  %p1667_p11 = scmp.ne.s32.totalorder %s2085_s11, %s1666_s6  ;;  %p2152_p0 = scmp.ne.s32.totalorder %s2145_s29, 0 }
  0x70   : > { %v1405_v24 = vpack.c.bf16 %v288_v23, %v286_v22  ;;  %v1976_v25 = vld [vmem:[%s1964_s14] sm:$0xff]  ;;  %vm2002_vm1 = vmpackc.low %vm302_vm0, %vm302_vm0  ;;  %v580_v1 = vld [vmem:[#allocation7 + $0x8] sm:$0xff]  ;;  %s1747_s14 = smov [#allocation8]  }
  0x71   : > { %v290_v30 = vld [vmem:[%s2133_s2] sm:$0x3]  ;;  %v581_v2 = vld [vmem:[#allocation7 + $0x10] sm:$0xff]  ;;  %v584_v7 = vld [vmem:[#allocation7 + $0x28] sm:$0xff]  ;;  %p1668_p1 = pnand %p1667_p11, %p2152_p0  ;;  %s1670_s24 = sshll.u32 %s1747_s14, 4  ;;  %s1671_s24 = int_to_ptr.vmem [resolvable:$false] %s1670_s24 }
  0x72   : > { %1398 = vmatpush1.bf16.msra.mxu0 %v1397_v14  ;;  %v295_v31 = vrot.slane %v290_v30, %v294_v29  ;;  %v299_v36 = vrot.slane %v290_v30, %v298_v32  ;;  %v579_v63 = vld [vmem:[#allocation7] sm:$0xff]  ;;  %v586_v10 = vld [vmem:[#allocation7 + $0x38] sm:$0xff]  ;;  %s1672_s26 = scalar_lea.vmem %s1671_s24, 512  ;;  %p1673_p5 = scmp.lt.s32.totalorder %s2085_s11, %s1671_s24 }
  0x73   : > { %1400 = vmatprep.subr.bf16.mxu0 %v1399_v15  ;;  %v1417_v3 = vpack.c.bf16 %v580_v1, %v579_v63  ;;  %v583_v6 = vld [vmem:[#allocation7 + $0x20] sm:$0xff]  ;;  %p1669_p3 = pneg %p1668_p1  ;;  %p1674_p9 = scmp.lt.s32.totalorder %s1672_s26, %s1666_s6 }
  0x75   : > { %p1675_p12 = por %p1674_p9, %p1673_p5 }
  0x76   : > { %1402 = vmatpush1.bf16.msra.mxu0 %v1401_v20 }
  0x77   : > { %1404 = vmatprep.subr.bf16.mxu0 %v1403_v21  ;;  %p1676_p2 = pnand %p1675_p12, %p1669_p3 }
  0x7a   : > { %1406 = vmatpush1.bf16.msra.mxu0 %v1405_v24 }
  0x7b   : > { %1434 = vmatprep.subr.bf16.mxu0 %v1391_v4  ;;  %v582_v4 = vld [vmem:[#allocation7 + $0x18] sm:$0xff] }
  0x7c   : > { %v1421_v5 = vpack.c.bf16 %v582_v4, %v581_v2 }
  0x7d   : > { %1260 = vmatmul.mubr.msk.f32.vlgmr.msra.gmra.mrb[0].mxu0 %vm302_vm0, %v1976_v25 }
  0x7e   : > { %379 = vmatprep.mubr.f32.mxu0 %v1745_v0  ;;  %1436 = vmatpush1.bf16.msra.mxu0 %v1393_v8  ;;  %v1425_v8 = vpack.c.bf16 %v584_v7, %v583_v6 }
  0x7f   : > { %1438 = vmatprep.subr.bf16.mxu0 %v1395_v9  ;;  %v585_v9 = vld [vmem:[#allocation7 + $0x30] sm:$0xff] }
  0x80   : > { %v1429_v11 = vpack.c.bf16 %v586_v10, %v585_v9 }
  0x81   : > { %1261 = vmatmul.mubr.msk.f32.gmra.mrb[2].mxu0 %vm302_vm0, %v1982_v26 }
  0x82   : > { %1440 = vmatpush1.bf16.msra.mxu0 %v1397_v14  ;;  %806 = vmatprep.mubr.f32.mxu0 %v1745_v0 }
  0x83   : > { %1442 = vmatprep.subr.bf16.mxu0 %v1399_v15 }
  0x86   : > { %1444 = vmatpush1.bf16.msra.mxu0 %v1401_v20  ;;  %v2022_v20 = vld [vmem:[%s2135_s4] ss:$0 sm:$0xff] }
  0x87   : > { %1446 = vmatprep.subr.bf16.mxu0 %v1403_v21 }
  0x8a   : > { %1448 = vmatpush1.bf16.msra.mxu0 %v1405_v24 }
 0x150   : > { %v375_v33 = vpop.f32.mrb[0].mxu0 }
 0x151   : > { %v376_v34 = vadd.f32 %v375_v33, %v295_v31  ;;  %v377_v35 = vpop.f32.mrb[1].mxu0 }
 0x152   : > { %v378_v40 = vadd.f32 %v377_v35, %v299_v36 }
 0x153   : > { %1329 = vmatprep.mubr.msk.f32.mxu1 %vm302_vm0, %v376_v34 }
 0x154   : > { %v381_v37 = vpop.f32.mrb[2].mxu0 }
 0x155   : > { %v382_v38 = vadd.f32 %v381_v37, %v295_v31  ;;  %v383_v39 = vpop.f32.mrb[3].mxu0 }
 0x156   : > { %v384_v41 = vadd.f32 %v383_v39, %v299_v36 }
 0x157   : > { %v1550_v42 = vpack.i.bf16 %v382_v38, %v376_v34 }
 0x158   : > { %v1413_v43 = vpack.c.bf16 %v384_v41, %v378_v40 }
 0x159   : > { %1551 = vrot.lane.b32.xlu0 %v1550_v42, %s1746_s12 }
 0x1cb   : > { %v1552_v44 = vpop.permute.xlu0 %1551 }
 0x1cc   : > { %v1554_v45 = vunpack.i.h.bf16 %v1552_v44  ;;  %v1553_v46 = vunpack.i.l.bf16 %v1552_v44 }
 0x1ce   : > { %v1407_v48 = vpack.c.bf16 %v1554_v45, %v1553_v46 }
 0x1d0   : > { %1409 = vmatprep.subr.msk.bf16.mxu1 %vm2002_vm1, %v1407_v48 }
 0x1d1   : > { %1412 = vmatpush3.bf16.xpose.msk.msra.mxu1 %vm2002_vm1, %v1407_v48 }
 0x1d2   : > { %1414 = vmatprep.subr.bf16.mxu1 %v1413_v43 }
 0x1d8   : > { %1330 = vmatmul.mubr.msk.f32.vlgmr.msra.gmra.mrb[0].mxu1 %vm302_vm0, %v382_v38 }
 0x1d9   : > { %1416 = vmatpush3.bf16.msra.mxu1 %v1413_v43 }
 0x1da   : > { %1418 = vmatprep.subr.bf16.mxu1 %v1417_v3 }
 0x2ab   : > { %v1331_v49 = vpop.f32.mrb[0].mxu1 }
 0x2ac   : > { %v466_v50 = vpop.f32.mrb[1].mxu1  ;;  %v479_v51 = vsel %vm475_vm2, %v1331_v49, -inf }
 0x2ad   : > { %480 = vmax.xlane.f32.xlu1 %v479_v51  ;;  %v476_v52 = vsel %vm475_vm2, %v466_v50, -inf }
 0x2ae   : > { %477 = vmax.xlane.f32.xlu0 %v476_v52 }
 0x33a   : > { %v481_v53 = vpop.xlane.xlu1 %480 }
 0x33b   : > { %v483_v54 = vsub.f32 %v1331_v49, %v481_v53  ;;  %v478_v55 = vpop.xlane.xlu0 %477 }
 0x33c   : > { %v482_v56 = vsub.f32 %v466_v50, %v478_v55 }
 0x33d   : > { %v486_v57 = vmul.f32 1.442695, %v483_v54 }
 0x33e   : > { %v484_v58 = vmul.f32 1.442695, %v482_v56 }
 0x340   : > { %1560 = vpow2.f32 %v484_v58 }
 0x341   : > { %1562 = vpow2.f32 %v486_v57 }
 0x34a   : > { %v1561_v59 = vpop.eup %1560 }
 0x34b   : > { %v1563_v60 = vpop.eup %1562  ;;  %1336 = vmatprep.mubr.msk.f32.mxu1 %vm475_vm2, %v1561_v59  ;;  %v488_v61 = vsel %vm475_vm2, %v1561_v59, 0.0 }
 0x34c   : > { %1337 = vmatmul.mubr.msk.f32.vlgmr.msra.gmra.mrb[2].mxu1 %vm475_vm2, %v1563_v60  ;;  %489 = vadd.xlane.f32.xlu1 %v488_v61  ;;  %v491_v62 = vsel %vm475_vm2, %v1563_v60, 0.0  ;;  %v724_v61 = vld [vmem:[%s2133_s2] sm:$0x3] }
 0x34d   : > { %1420 = vmatpush3.bf16.msra.mxu1 %v1417_v3 }
 0x34e   : > { %1422 = vmatprep.subr.bf16.mxu1 %v1421_v5 }
 0x350   : > { %492 = vadd.xlane.f32.xlu1 %v491_v62  ;;  %v729_v62 = vrot.slane %v724_v61, %v294_v29 }
 0x351   : > { %1424 = vmatpush3.bf16.msra.mxu1 %v1421_v5 }
 0x352   : > { %1426 = vmatprep.subr.bf16.mxu1 %v1425_v8 }
 0x355   : > { %1428 = vmatpush3.bf16.msra.mxu1 %v1425_v8 }
 0x356   : > { %1430 = vmatprep.subr.bf16.mxu1 %v1429_v11 }
 0x359   : > { %1432 = vmatpush3.bf16.msra.mxu1 %v1429_v11 }
 0x35a   : > { %1460 = vmatprep.subr.bf16.mxu1 %v1417_v3 }
 0x3d9   : > { %v490_v12 = vpop.xlane.xlu1 %489 }
 0x3da   : > { %1564 = vrcp.f32 %v490_v12 }
 0x3dd   : > { %v493_v13 = vpop.xlane.xlu1 %492 }
 0x3de   : > { %1566 = vrcp.f32 %v493_v13 }
 0x3e4   : > { %v1565_v15 = vpop.eup %1564 }
 0x3e8   : > { %v1567_v17 = vpop.eup %1566 }
 0x41f   : > { %v1338_v14 = vpop.f32.mrb[2].mxu1 }
 0x420   : > { %v566_v16 = vpop.f32.mrb[3].mxu1  ;;  %v578_v19 = vmul.f32 %v1567_v17, %v1338_v14 }
 0x421   : > { %v576_v18 = vmul.f32 %v1565_v15, %v566_v16 }
 0x423   : > { %1355 = vmatprep.mubr.msk.f32.mxu1 %vm302_vm0, %v576_v18 }
 0x424   : > { %1356 = vmatmul.mubr.msk.f32.vlgmr.msra.gmra.mrb[4].mxu1 %vm302_vm0, %v578_v19 }
 0x425   : > { %1462 = vmatpush3.bf16.msra.mxu1 %v1417_v3  ;;  %v733_v3 = vrot.slane %v724_v61, %v298_v32 }
 0x426   : > { %1464 = vmatprep.subr.bf16.mxu1 %v1421_v5 }
 0x429   : > { %1466 = vmatpush3.bf16.msra.mxu1 %v1421_v5 }
 0x42a   : > { %1468 = vmatprep.subr.bf16.mxu1 %v1425_v8 }
 0x42d   : > { %1470 = vmatpush3.bf16.msra.mxu1 %v1425_v8 }
 0x42e   : > { %1472 = vmatprep.subr.bf16.mxu1 %v1429_v11 }
 0x431   : > { %1474 = vmatpush3.bf16.msra.mxu1 %v1429_v11 }
 0x4f7   : > { %v1357_v21 = vpop.f32.mrb[4].mxu1 }
 0x4f8   : > { %v672_v22 = vadd.f32 %v1357_v21, %v2022_v20  ;;  %v666_v23 = vpop.f32.mrb[5].mxu1 }
 0x4f9   : > { %v667_v24 = vadd.f32 %v2022_v20, %v666_v23 }
 0x4fa   : > { %v676_v27 = vadd.f32 %v672_v22, %v1982_v26 }
 0x4fb   : > { %v675_v30 = vadd.f32 %v667_v24, %v1976_v25 }
 0x4fc   : > { %v678_v31 = vsel %vm302_vm0, %v676_v27, 0.0 }
 0x4fd   : > { %v677_v33 = vsel %vm302_vm0, %v675_v30, 0.0 }
 0x4fe   : > { %v679_v34 = vadd.f32 %v678_v31, %v677_v33 }
 0x500   : > { %v680_v35 = vrot.slane %v679_v34, 4 }
 0x502   : > { %v681_v36 = vadd.f32 %v680_v35, %v679_v34 }
 0x504   : > { %v682_v37 = vrot.slane %v681_v36, 2 }
 0x506   : > { %v683_v38 = vadd.f32 %v682_v37, %v681_v36 }
 0x508   : > { %v684_v39 = vrot.slane %v683_v38, 1 }
 0x50a   : > { %v685_v40 = vadd.f32 %v684_v39, %v683_v38 }
 0x50c   : > { %v687_v41 = vmul.f32 0.0625, %v685_v40 }
 0x50e   : > { %v688_v42 = vsub.f32 %v675_v30, %v687_v41  ;;  %v689_v43 = vsub.f32 %v676_v27, %v687_v41 }
 0x510   : > { %v690_v44 = vmul.f32 %v688_v42, %v688_v42  ;;  %v691_v45 = vmul.f32 %v689_v43, %v689_v43 }
 0x512   : > { %v692_v26 = vsel %vm302_vm0, %v690_v44, 0.0  ;;  %v693_v25 = vsel %vm302_vm0, %v691_v45, 0.0 }
 0x513   : > { %v694_v46 = vadd.f32 %v693_v25, %v692_v26 }
 0x515   : > { %v695_v48 = vrot.slane %v694_v46, 4 }
 0x517   : > { %v696_v49 = vadd.f32 %v695_v48, %v694_v46 }
 0x519   : > { %v697_v50 = vrot.slane %v696_v49, 2 }
 0x51b   : > { %v698_v51 = vadd.f32 %v697_v50, %v696_v49 }
 0x51d   : > { %v699_v52 = vrot.slane %v698_v51, 1 }
 0x51f   : > { %v700_v53 = vadd.f32 %v699_v52, %v698_v51 }
 0x521   : > { %v701_v54 = vmul.f32 0.0625, %v700_v53 }
 0x523   : > { %v702_v55 = vadd.f32 1e-05, %v701_v54 }
 0x525   : > { %1568 = vrsqrt.f32 %v702_v55 }
 0x52f   : > { %v1569_v56 = vpop.eup %1568 }
 0x530   : > { %v2032_v57 = vmul.f32 %v1569_v56, %v688_v42  ;;  %v2034_v58 = vmul.f32 %v1569_v56, %v689_v43 }
 0x532   : > { %v706_v59 = vmax.f32 %v2032_v57, 0.0  ;;  %v707_v60 = vmax.f32 %v2034_v58, 0.0 }
 0x534   : > { %1271 = vmatmul.mubr.msk.f32.vlgmr.msra.gmra.mrb[4].mxu0 %vm302_vm0, %v706_v59 }
 0x535   : > { %812 = vmatprep.mubr.f32.mxu0 %v1745_v0 }
 0x538   : > { %1272 = vmatmul.mubr.msk.f32.gmra.mrb[6].mxu0 %vm302_vm0, %v707_v60 }
 0x607   : > { %v808_v63 = vpop.f32.mrb[4].mxu0 }
 0x608   : > { %v809_v1 = vadd.f32 %v808_v63, %v729_v62  ;;  %v810_v2 = vpop.f32.mrb[5].mxu0 }
 0x609   : > { %v811_v6 = vadd.f32 %v810_v2, %v733_v3 }
 0x60a   : > { %1362 = vmatprep.mubr.msk.f32.mxu0 %vm302_vm0, %v809_v1 }
 0x60b   : > { %v814_v0 = vpop.f32.mrb[6].mxu0 }
 0x60c   : > { %v815_v4 = vadd.f32 %v814_v0, %v729_v62  ;;  %v816_v5 = vpop.f32.mrb[7].mxu0 }
 0x60d   : > { %v817_v7 = vadd.f32 %v816_v5, %v733_v3 }
 0x60e   : > { %v1555_v8 = vpack.i.bf16 %v815_v4, %v809_v1 }
 0x60f   : > { %v1455_v9 = vpack.c.bf16 %v817_v7, %v811_v6 }
 0x610   : > { %1556 = vrot.lane.b32.xlu1 %v1555_v8, %s1746_s12 }
 0x682   : > { %v1557_v10 = vpop.permute.xlu1 %1556 }
 0x683   : > { %v1559_v11 = vunpack.i.h.bf16 %v1557_v10  ;;  %v1558_v29 = vunpack.i.l.bf16 %v1557_v10 }
 0x685   : > { %v1449_v12 = vpack.c.bf16 %v1559_v11, %v1558_v29 }
 0x687   : > { %1451 = vmatprep.subr.msk.bf16.mxu0 %vm2002_vm1, %v1449_v12 }
 0x688   : > { %1454 = vmatpush3.bf16.xpose.msk.msra.mxu0 %vm2002_vm1, %v1449_v12 }
 0x689   : > { %1456 = vmatprep.subr.bf16.mxu0 %v1455_v9 }
 0x68f   : > { %1363 = vmatmul.mubr.msk.f32.vlgmr.msra.gmra.mrb[8].mxu0 %vm302_vm0, %v815_v4 }
 0x690   : > { %1458 = vmatpush3.bf16.msra.mxu0 %v1455_v9 }
 0x762   : > { %v1364_v28 = vpop.f32.mrb[8].mxu0 }
 0x763   : > { %v899_v32 = vpop.f32.mrb[9].mxu0  ;;  %v911_v13 = vsel %vm475_vm2, %v1364_v28, -inf }
 0x764   : > { %912 = vmax.xlane.f32.xlu0 %v911_v13  ;;  %v908_v14 = vsel %vm475_vm2, %v899_v32, -inf }
 0x765   : > { %909 = vmax.xlane.f32.xlu1 %v908_v14 }
 0x7f1   : > { %v913_v15 = vpop.xlane.xlu0 %912 }
 0x7f2   : > { %v915_v16 = vsub.f32 %v1364_v28, %v913_v15  ;;  %v910_v17 = vpop.xlane.xlu1 %909 }
 0x7f3   : > { %v914_v18 = vsub.f32 %v899_v32, %v910_v17 }
 0x7f4   : > { %v918_v19 = vmul.f32 1.442695, %v915_v16 }
 0x7f5   : > { %v916_v21 = vmul.f32 1.442695, %v914_v18 }
 0x7f7   : > { %1570 = vpow2.f32 %v916_v21 }
 0x7f8   : > { %1572 = vpow2.f32 %v918_v19 }
 0x801   : > { %v1571_v47 = vpop.eup %1570 }
 0x802   : > { %v1573_v22 = vpop.eup %1572  ;;  %1369 = vmatprep.mubr.msk.f32.mxu0 %vm475_vm2, %v1571_v47  ;;  %v920_v23 = vsel %vm475_vm2, %v1571_v47, 0.0 }
 0x803   : > { %1370 = vmatmul.mubr.msk.f32.vlgmr.msra.gmra.mrb[10].mxu0 %vm475_vm2, %v1573_v22  ;;  %921 = vadd.xlane.f32.xlu0 %v920_v23  ;;  %v923_v24 = vsel %vm475_vm2, %v1573_v22, 0.0 }
 0x807   : > { %924 = vadd.xlane.f32.xlu0 %v923_v24 }
 0x890   : > { %v922_v27 = vpop.xlane.xlu0 %921 }
 0x891   : > { %1574 = vrcp.f32 %v922_v27 }
 0x894   : > { %v925_v30 = vpop.xlane.xlu0 %924 }
 0x895   : > { %1576 = vrcp.f32 %v925_v30 }
 0x89b   : > { %v1575_v33 = vpop.eup %1574 }
 0x89f   : > { %v1577_v35 = vpop.eup %1576 }
 0x8d6   : > { %v1371_v31 = vpop.f32.mrb[10].mxu0 }
 0x8d7   : > { %v998_v34 = vpop.f32.mrb[11].mxu0  ;;  %v1010_v37 = vmul.f32 %v1577_v35, %v1371_v31 }
 0x8d8   : > { %v1008_v36 = vmul.f32 %v1575_v33, %v998_v34 }
 0x8da   : > { %1388 = vmatprep.mubr.msk.f32.mxu1 %vm302_vm0, %v1008_v36 }
 0x8db   : > { %1389 = vmatmul.mubr.msk.f32.vlgmr.msra.gmra.mrb[6].mxu1 %vm302_vm0, %v1010_v37 }
 0x9ae   : > { %v1390_v38 = vpop.f32.mrb[6].mxu1 }
 0x9af   : > { %v1104_v39 = vadd.f32 %v1390_v38, %v2022_v20  ;;  %v1098_v40 = vpop.f32.mrb[7].mxu1 }
 0x9b0   : > { %v1099_v41 = vadd.f32 %v2022_v20, %v1098_v40 }
 0x9b1   : > { %v1108_v42 = vadd.f32 %v1104_v39, %v707_v60 }
 0x9b2   : > { %v1107_v43 = vadd.f32 %v1099_v41, %v706_v59 }
 0x9b3   : > { %v1110_v44 = vsel %vm302_vm0, %v1108_v42, 0.0 }
 0x9b4   : > { %v1109_v45 = vsel %vm302_vm0, %v1107_v43, 0.0 }
 0x9b5   : > { %v1111_v26 = vadd.f32 %v1110_v44, %v1109_v45 }
 0x9b7   : > { %v1112_v25 = vrot.slane %v1111_v26, 4 }
 0x9b9   : > { %v1113_v46 = vadd.f32 %v1112_v25, %v1111_v26 }
 0x9bb   : > { %v1114_v48 = vrot.slane %v1113_v46, 2 }
 0x9bd   : > { %v1115_v49 = vadd.f32 %v1114_v48, %v1113_v46 }
 0x9bf   : > { %v1116_v50 = vrot.slane %v1115_v49, 1 }
 0x9c1   : > { %v1117_v51 = vadd.f32 %v1116_v50, %v1115_v49 }
 0x9c3   : > { %v1118_v52 = vmul.f32 0.0625, %v1117_v51 }
 0x9c5   : > { %v1119_v53 = vsub.f32 %v1107_v43, %v1118_v52  ;;  %v1120_v20 = vsub.f32 %v1108_v42, %v1118_v52 }
 0x9c7   : > { %v1121_v54 = vmul.f32 %v1119_v53, %v1119_v53  ;;  %v1122_v55 = vmul.f32 %v1120_v20, %v1120_v20 }
 0x9c9   : > { %v1123_v56 = vsel %vm302_vm0, %v1121_v54, 0.0  ;;  %v1124_v57 = vsel %vm302_vm0, %v1122_v55, 0.0 }
 0x9ca   : > { %v1125_v58 = vadd.f32 %v1124_v57, %v1123_v56 }
 0x9cc   : > { %v1126_v59 = vrot.slane %v1125_v58, 4 }
 0x9ce   : > { %v1127_v60 = vadd.f32 %v1126_v59, %v1125_v58 }
 0x9d0   : > { %v1128_v61 = vrot.slane %v1127_v60, 2 }
 0x9d2   : > { %v1129_v62 = vadd.f32 %v1128_v61, %v1127_v60 }
 0x9d4   : > { %v1130_v63 = vrot.slane %v1129_v62, 1 }
 0x9d6   : > { %v1131_v1 = vadd.f32 %v1130_v63, %v1129_v62 }
 0x9d8   : > { %v1132_v2 = vmul.f32 0.0625, %v1131_v1 }
 0x9da   : > { %v1133_v3 = vadd.f32 1e-05, %v1132_v2 }
 0x9dc   : > { %1578 = vrsqrt.f32 %v1133_v3 }
 0x9e6   : > { %v1579_v0 = vpop.eup %1578 }
 0x9e7   : > { %v1135_v4 = vmul.f32 %v1579_v0, %v1119_v53  ;;  %v1136_v5 = vmul.f32 %v1579_v0, %v1120_v20 }
 0x9e9   : > { %v1137_v6 = vmax.f32 %v1135_v4, 0.0  ;;  %v1138_v7 = vmax.f32 %v1136_v5, 0.0 }
 0x9eb   : > { %1139 = vst.msk [vmem:[%s271_s30] sm:$0xff] %vm302_vm0, %v1137_v6  ;;  %1140 = vst.msk [vmem:[%s271_s30 + $0x8] sm:$0xff] %vm302_vm0, %v1138_v7 }
 0x9ec   : > { %1679 = shalt.err (!%p1676_p2)
}
 0x9ed   : > { %s1680_s12 = scalar_lea.hbm %s2083_s8, 256  ;;  %s1684_s28 = scalar_lea.hbm %s2136_s5, 512 }
 0x9ee   : > { %p1681_p13 = scmp.ne.s32.totalorder %s2083_s8, %s1680_s12  ;;  %p1685_p4 = scmp.lt.u32.totalorder %s2083_s8, %s2136_s5 }
 0x9ef   : > { %p1686_p7 = scmp.lt.u32.totalorder %s1684_s28, %s1680_s12  ;;  %p1688_p11 = scmp.lt.u32.totalorder %s1680_s12, %s2083_s8 }
 0x9f0   : > { %p1682_p6 = pnand %p1681_p13, %p2152_p0 }
 0x9f1   : > { %p1687_p8 = por %p1686_p7, %p1685_p4 }
 0x9f2   : > { %p1683_p10 = pneg %p1682_p6 }
 0x9f3   : > { %p1689_p1 = por %p1688_p11, %p1687_p8 }
 0x9f5   : > { %p1690_p3 = pnand %p1689_p1, %p1683_p10 }
 0x9f7   : > { %1693 = shalt.err (!%p1690_p3)
}
 0x9f8   : > { %s1748_s30 = smov 128   ;;  %s1749_s23 = smov 8  }
 0x9f9   : > { %1485 = dma.vmem_to_hbm [thread:$0]  (%p2152_p0), %s2085_s11, 256, %s2083_s8, %s1142_s22, %s1748_s30, %s1748_s30, %s1749_s23  }
 0x9fa PF: > { %s1170_s7 = sand.u32 1, %s1724_s18   ;;  %p2153_p5 = scmp.ne.s32.totalorder %s2141_s25, 0 }
 0x9fb   : > { %p2154_p9 = scmp.ge.s32.totalorder %s1736_s21, 2  ;;  %s1171_s6 = scalar_lea.sflag [#allocation4], %s1170_s7 }
 0x9fd   : > { %p1499_p12 = pnand %p2154_p9, %p2153_p5 }
 0x9ff   : > { %1719 = dma.done.wait (!%p1499_p12), %s1171_s6, 256  }
 0xa00   : > { %1721 = vsyncadd (!%p1499_p12), %s1171_s6, 4294967040  ;;  %p19_p2 = scmp.ge.s32.totalorder %s1893_s16, 4   ;;  %s2155_s18 = smov %s1728_s19 }
 0xa01   : > { %s2156_s19 = smov %s1732_s20  ;;  %s2157_s20 = smov %s1902_s27 }
 0xa02   : > { %s2158_s21 = smov %s1893_s16  ;;  %21 = sbr.rel (!%p19_p2) target bundleno = 6 (0x6), region = 93 }
 0xa09   :  { %1176 = vsyncpa [#allocation3], 1 }
 0xa0a   :  { %1178 = vsyncpa [#allocation3 + $0x1], 1 }
 0xa0b   :  { %1179 = vsyncpa [#allocation6], 1 }
 0xa0c   :  { %1180 = vsyncpa [#allocation4], 1 }
 0xa0d   :  { %1182 = vsyncpa [#allocation4 + $0x1], 1 }

</bundles_post_ra>
